<compile_context>
chip_gen: v7x
topology: tpu7x:2x2x1
jax: 0.10.0
libtpu: 0.0.40
codegen_flags: <defaults>
</compile_context>

<pallas_src>
import math

import jax
import jax.numpy as jnp
from jax import lax
from jax.experimental import pallas as pl
from jax.experimental.pallas import tpu as pltpu


def make_fixed_embedding_table(c_in: int, d_model: int) -> jnp.ndarray:
    """Deterministic sinusoidal table, matching the PyTorch __init__ exactly."""
    assert d_model % 2 == 0, "even d_model assumed (PyTorch code interleaves sin/cos)"
    position = jnp.arange(0, c_in, dtype=jnp.float32)[:, None]              # (c_in, 1)
    div_term = jnp.exp(jnp.arange(0, d_model, 2, dtype=jnp.float32)
                       * -(math.log(10000.0) / d_model))                     # (d_model/2,)
    angles = position * div_term                                             # (c_in, d_model/2)
    # interleave: w[:, 0::2] = sin, w[:, 1::2] = cos
    w = jnp.stack([jnp.sin(angles), jnp.cos(angles)], axis=-1).reshape(c_in, d_model)
    return w.astype(jnp.float32)


def _embed_kernel(idx_ref, w_ref, out_ref):
    # idx_ref: (rows, pack) int32         -- pack tokens per lane-dense output row
    # w_ref:   (pack*c_in, pack*d_model)  -- block-diagonal copies of the table
    # out_ref: (rows, pack*d_model) f32   -- 128-lane-dense when 128 % d_model == 0
    idx = idx_ref[...]
    rows, pack = idx.shape
    kdim = w_ref.shape[0]
    c_in = kdim // pack

    col = lax.broadcasted_iota(jnp.int32, (rows, kdim), 1)
    # gathered[r, c] = idx[r, c // c_in]; tbl_row[r, c] = c % c_in.
    # pack is a small static int -> unrolled VPU selects (no div/mod, no reshape).
    gathered = jnp.broadcast_to(idx[:, 0:1], (rows, kdim))
    tbl_row = col
    for j in range(1, pack):
        in_blk_or_later = col >= j * c_in
        gathered = jnp.where(in_blk_or_later, idx[:, j:j + 1], gathered)
        tbl_row = jnp.where(in_blk_or_later, col - j * c_in, tbl_row)

    # Exactly one 1.0 per (row, packed-slot): the matmul reproduces the gather
    # bit-for-bit (single nonzero product per output element).
    one_hot = (gathered == tbl_row).astype(w_ref.dtype)
    out_ref[...] = jnp.dot(one_hot, w_ref[...],
                           preferred_element_type=jnp.float32).astype(out_ref.dtype)


def fixed_embedding(x: jnp.ndarray, w: jnp.ndarray, *, rows_per_tile: int = 1024) -> jnp.ndarray:
    """x: (B, S) integer indices in [0, c_in). Returns (B, S, d_model) float32."""
    B, S = x.shape
    c_in, d_model = w.shape

    # Pack enough tokens per output row that the store is 128-lane dense.
    if d_model % 128 == 0:
        pack = 1                       # already lane-dense
    elif 128 % d_model == 0:
        pack = 128 // d_model          # pack tokens -> 128-wide output rows
    else:
        pack = 1                       # rare odd d_model: fall back to masked stores
    out_w = pack * d_model

    n = B * S
    n_rows = pl.cdiv(n, pack)                                  # packed output rows needed
    rows_per_tile = max(8, (rows_per_tile // 8) * 8)           # sublane-aligned tile height
    rows = min(rows_per_tile, max(8, pl.cdiv(n_rows, 8) * 8))  # shrink for tiny inputs
    n_rows_pad = pl.cdiv(n_rows, rows) * rows
    n_pad_tokens = n_rows_pad * pack

    # Index prep: clamp (gather-like OOB behavior), flatten, pad, pack.
    idx_flat = jnp.clip(x.reshape(-1).astype(jnp.int32), 0, c_in - 1)
    idx_flat = jnp.pad(idx_flat, (0, n_pad_tokens - n))
    idx2d = idx_flat.reshape(n_rows_pad, pack)

    # Block-diagonal table: (pack*c_in, pack*d_model); == w when pack == 1.
    wbig = jnp.kron(jnp.eye(pack, dtype=jnp.float32), w.astype(jnp.float32))

    # Table is resident (constant index map). Only single-buffer it when it is
    # large enough that double-buffering would meaningfully eat VMEM.
    table_bytes = int(wbig.size) * 4
    if table_bytes > (4 << 20):
        table_spec = pl.BlockSpec((pack * c_in, out_w), lambda i: (0, 0),
                                  pipeline_mode=pl.Buffered(1))
        table_buf = 1
    else:
        table_spec = pl.BlockSpec((pack * c_in, out_w), lambda i: (0, 0))
        table_buf = 2

    # Explicit VMEM budget (matters on v7x's 64 MiB physical / 32 MiB default).
    per_step = (2 * rows * pack * 4            # idx tiles (double-buffered)
                + 2 * rows * out_w * 4         # output tiles (double-buffered)
                + table_buf * table_bytes      # resident table
                + rows * pack * c_in * 4)      # one-hot intermediate
    vmem_limit = int(min(48 << 20, max(32 << 20, 2 * per_step)))

    cost = pl.CostEstimate(
        flops=2 * n_rows_pad * (pack * c_in) * out_w,
        transcendentals=0,
        bytes_accessed=int(idx2d.size) * 4 + table_bytes + n_rows_pad * out_w * 4,
    )

    out = pl.pallas_call(
        _embed_kernel,
        out_shape=jax.ShapeDtypeStruct((n_rows_pad, out_w), jnp.float32),
        grid_spec=pltpu.PrefetchScalarGridSpec(
            num_scalar_prefetch=0,
            grid=(n_rows_pad // rows,),
            in_specs=[
                pl.BlockSpec((rows, pack), lambda i: (i, 0)),   # packed index tile
                table_spec,                                     # full (block-diag) table
            ],
            out_specs=pl.BlockSpec((rows, out_w), lambda i: (i, 0)),  # lane-dense output
        ),
        compiler_params=pltpu.CompilerParams(
            dimension_semantics=("parallel",),   # shards across both TCs on v7x
            vmem_limit_bytes=vmem_limit),
        cost_estimate=cost,
    )(idx2d, wbig)

    return out.reshape(n_pad_tokens, d_model)[:n].reshape(B, S, d_model)


if __name__ == "__main__":
    # Small shapes consistent with the module: indices (batch=2, seq=8), c_in=32, d_model=32.
    B, S = 2, 8
    c_in, d_model = 32, 32

    key = jax.random.PRNGKey(0)
    x = jax.random.randint(key, (B, S), minval=0, maxval=c_in, dtype=jnp.int32)

    w = make_fixed_embedding_table(c_in, d_model)

    embed = jax.jit(fixed_embedding)   # fuse index prep / table prep with the call
    out = embed(x, w)
    out = jax.block_until_ready(out)

    # sanity check vs. plain-JAX gather (same semantics as nn.Embedding lookup)
    ref = jnp.take(w, x.reshape(-1), axis=0).reshape(B, S, d_model)
    assert out.shape == (B, S, d_model) and out.dtype == jnp.float32
    assert jnp.allclose(out, ref, atol=1e-6), "mismatch vs reference gather"

    print("KERNEL_OK")
</pallas_src>

<mosaic_0001>
module attributes {stable_mosaic.version = 11 : i64} {
  func.func @_embed_kernel(%arg0: i32, %arg1: memref<8x4xi32, #tpu.memory_space<vmem>>, %arg2: memref<128x128xf32, #tpu.memory_space<vmem>>, %arg3: memref<8x128xf32, #tpu.memory_space<vmem>>) attributes {dimension_semantics = [#tpu.dimension_semantics<parallel>], iteration_bounds = array<i64: 1>, scalar_prefetch = 0 : i64, scratch_operands = 0 : i64, tpu.core_type = #tpu.core_type<tc>, window_params = [{transform_indices = @transform_0, window_bounds = array<i64: 8, 4>}, {pipeline_mode = #tpu.pipeline_mode<synchronous>, transform_indices = @transform_1, window_bounds = array<i64: 128, 128>}, {transform_indices = @transform_2, window_bounds = array<i64: 8, 128>}]} {
    %c0 = arith.constant 0 : index
    %c0_0 = arith.constant 0 : index
    %0 = vector.load %arg1[%c0, %c0_0] : memref<8x4xi32, #tpu.memory_space<vmem>>, vector<8x4xi32>
    %1 = tpu.iota {dimensions = array<i32: 1>} : vector<8x128xi32>
    %2 = vector.extract_strided_slice %0 {offsets = [0, 0], sizes = [8, 1], strides = [1, 1]} : vector<8x4xi32> to vector<8x1xi32>
    %3 = vector.shape_cast %2 : vector<8x1xi32> to vector<8x1xi32>
    %4 = vector.broadcast %3 : vector<8x1xi32> to vector<8x128xi32>
    %c32_i32 = arith.constant 32 : i32
    %5 = vector.broadcast %c32_i32 : i32 to vector<8x128xi32>
    %6 = arith.cmpi sge, %1, %5 : vector<8x128xi32>
    %7 = vector.extract_strided_slice %0 {offsets = [0, 1], sizes = [8, 1], strides = [1, 1]} : vector<8x4xi32> to vector<8x1xi32>
    %8 = vector.shape_cast %7 : vector<8x1xi32> to vector<8x1xi32>
    %9 = vector.broadcast %8 : vector<8x1xi32> to vector<8x128xi32>
    %10 = arith.select %6, %9, %4 : vector<8x128xi1>, vector<8x128xi32>
    %c32_i32_1 = arith.constant 32 : i32
    %11 = vector.broadcast %c32_i32_1 : i32 to vector<8x128xi32>
    %12 = arith.subi %1, %11 : vector<8x128xi32>
    %13 = arith.select %6, %12, %1 : vector<8x128xi1>, vector<8x128xi32>
    %c64_i32 = arith.constant 64 : i32
    %14 = vector.broadcast %c64_i32 : i32 to vector<8x128xi32>
    %15 = arith.cmpi sge, %1, %14 : vector<8x128xi32>
    %16 = vector.extract_strided_slice %0 {offsets = [0, 2], sizes = [8, 1], strides = [1, 1]} : vector<8x4xi32> to vector<8x1xi32>
    %17 = vector.shape_cast %16 : vector<8x1xi32> to vector<8x1xi32>
    %18 = vector.broadcast %17 : vector<8x1xi32> to vector<8x128xi32>
    %19 = arith.select %15, %18, %10 : vector<8x128xi1>, vector<8x128xi32>
    %c64_i32_2 = arith.constant 64 : i32
    %20 = vector.broadcast %c64_i32_2 : i32 to vector<8x128xi32>
    %21 = arith.subi %1, %20 : vector<8x128xi32>
    %22 = arith.select %15, %21, %13 : vector<8x128xi1>, vector<8x128xi32>
    %c96_i32 = arith.constant 96 : i32
    %23 = vector.broadcast %c96_i32 : i32 to vector<8x128xi32>
    %24 = arith.cmpi sge, %1, %23 : vector<8x128xi32>
    %25 = vector.extract_strided_slice %0 {offsets = [0, 3], sizes = [8, 1], strides = [1, 1]} : vector<8x4xi32> to vector<8x1xi32>
    %26 = vector.shape_cast %25 : vector<8x1xi32> to vector<8x1xi32>
    %27 = vector.broadcast %26 : vector<8x1xi32> to vector<8x128xi32>
    %28 = arith.select %24, %27, %19 : vector<8x128xi1>, vector<8x128xi32>
    %c96_i32_3 = arith.constant 96 : i32
    %29 = vector.broadcast %c96_i32_3 : i32 to vector<8x128xi32>
    %30 = arith.subi %1, %29 : vector<8x128xi32>
    %31 = arith.select %24, %30, %22 : vector<8x128xi1>, vector<8x128xi32>
    %32 = arith.cmpi eq, %28, %31 : vector<8x128xi32>
    %33 = arith.extui %32 : vector<8x128xi1> to vector<8x128xi32>
    %34 = arith.sitofp %33 : vector<8x128xi32> to vector<8x128xf32>
    %c0_4 = arith.constant 0 : index
    %c0_5 = arith.constant 0 : index
    %35 = vector.load %arg2[%c0_4, %c0_5] : memref<128x128xf32, #tpu.memory_space<vmem>>, vector<128x128xf32>
    %cst = arith.constant dense<0.000000e+00> : vector<8x128xf32>
    %36 = tpu.matmul %34, %35, %cst {dimension_numbers = #tpu.dot_dimension_numbers<[1], [0], [0], [1], [0, 0, 1, 1], [], []>} : vector<8x128xf32>, vector<128x128xf32>, vector<8x128xf32> -> vector<8x128xf32>
    %c0_6 = arith.constant 0 : index
    %c0_7 = arith.constant 0 : index
    %37 = vector.load %arg3[%c0_6, %c0_7] : memref<8x128xf32, #tpu.memory_space<vmem>>, vector<8x128xf32>
    tpu.vector_store %arg3[%c0_6, %c0_7], %36 {strides = array<i32>} : memref<8x128xf32, #tpu.memory_space<vmem>>, vector<8x128xf32>,
    return
  }
  func.func @transform_0(%arg0: i32) -> (i32, i32) {
    %c0_i32 = arith.constant 0 : i32
    %c0_i32_0 = arith.constant 0 : i32
    return %arg0, %c0_i32 : i32, i32
  }
  func.func @transform_1(%arg0: i32) -> (i32, i32) {
    %c0_i32 = arith.constant 0 : i32
    %c0_i32_0 = arith.constant 0 : i32
    %c0_i32_1 = arith.constant 0 : i32
    return %c0_i32, %c0_i32_0 : i32, i32
  }
  func.func @transform_2(%arg0: i32) -> (i32, i32) {
    %c0_i32 = arith.constant 0 : i32
    %c0_i32_0 = arith.constant 0 : i32
    return %arg0, %c0_i32 : i32, i32
  }
}

</mosaic_0001>

<bundles_post_ra>
// kernel: fixed_embedding.1
= control target key start
LH: loop header
LB: loop body
LE: loop exit
PB: predicated region body
PF: predicated region fallthrough
CT: control target
= control target key end

     0   :  { %v226_v0 = vmov 0   ;;  %v227_v2 = vmov 2   ;;  %v228_v8 = vmov 0.0|0.0   ;;  %v229_v12 = vmov 1   ;;  %s303_s0 = inlined_call_operand.vmem [shape: s32[8,4], index: 0, kind: input, shape index: {}]   ;;  %s304_s1 = inlined_call_operand.vmem [shape: f32[128,128], index: 1, kind: input, shape index: {}]   ;;  %s305_s2 = inlined_call_operand.vmem [shape: f32[8,128], index: 2, kind: output, shape index: {}]  }
   0x1   :  { %221 = vset.pattern.permute.xlu0 %v226_v0  ;;  %v11_v1 = vld [vmem:[%s303_s0] sm:$0xff]  ;;  %223 = vset.pattern.permute.xlu1 %v227_v2  ;;  %v42_v4 = vld [vmem:[%s304_s1 + $0x8] sm:$0xff]  ;;  %v43_v6 = vld [vmem:[%s304_s1 + $0x10] sm:$0xff]  ;;  %v230_v13 = vmov 3   ;;  %vm231_vm0 = vmmov 0   ;;  %v232_v17 = vmov 0.0   ;;  %v12_v31 = vlaneseq }
   0x2   :  { %v41_v3 = vld [vmem:[%s304_s1] sm:$0xff]  ;;  %15 = vperm.xlu0 %221, %v11_v1   ;;  %26 = vperm.xlu1 %223, %v11_v1   ;;  %v44_v7 = vld [vmem:[%s304_s1 + $0x18] sm:$0xff]  ;;  %v46_v11 = vld [vmem:[%s304_s1 + $0x28] sm:$0xff]  ;;  %v233_v46 = vmov 1.0  }
   0x3   :  { %v190_v5 = vpack.c.bf16 %v42_v4, %v41_v3  ;;  %189 = vmatprep.subr.bf16.mxu0 %v228_v8  ;;  %v193_v9 = vpack.c.bf16 %v44_v7, %v43_v6  ;;  %v45_v10 = vld [vmem:[%s304_s1 + $0x20] sm:$0xff]  ;;  %v47_v15 = vld [vmem:[%s304_s1 + $0x30] sm:$0xff]  ;;  %v48_v16 = vld [vmem:[%s304_s1 + $0x38] sm:$0xff]  ;;  %186 = vmatprep.mubr.msk.f32.mxu0 %vm231_vm0, %v232_v17  ;;  %v13_v32 = vand.u32 127, %v12_v31 }
   0x4   :  { %v196_v14 = vpack.c.bf16 %v46_v11, %v45_v10  ;;  %v199_v18 = vpack.c.bf16 %v48_v16, %v47_v15  ;;  %v49_v19 = vld [vmem:[%s304_s1 + $0x40] sm:$0xff]  ;;  %v50_v20 = vld [vmem:[%s304_s1 + $0x48] sm:$0xff]  ;;  %v51_v22 = vld [vmem:[%s304_s1 + $0x50] sm:$0xff] }
   0x5   :  { %191 = vmatpush3.bf16.msra.mxu0 %v190_v5  ;;  %v202_v21 = vpack.c.bf16 %v50_v20, %v49_v19  ;;  %v52_v23 = vld [vmem:[%s304_s1 + $0x58] sm:$0xff]  ;;  %v53_v25 = vld [vmem:[%s304_s1 + $0x60] sm:$0xff]  ;;  %v54_v26 = vld [vmem:[%s304_s1 + $0x68] sm:$0xff]  ;;  %v132_v33 = vadd.s32 4294967264, %v13_v32  ;;  %vm17_vm1 = vcmp.ge.s32.totalorder %v13_v32, 32  ;;  %v133_v34 = vadd.s32 4294967232, %v13_v32 }
   0x6   :  { %192 = vmatprep.subr.bf16.mxu0 %v228_v8  ;;  %222 = vset.pattern.permute.xlu0 %v229_v12  ;;  %v205_v24 = vpack.c.bf16 %v52_v23, %v51_v22  ;;  %v208_v27 = vpack.c.bf16 %v54_v26, %v53_v25  ;;  %v55_v28 = vld [vmem:[%s304_s1 + $0x70] sm:$0xff]  ;;  %v56_v29 = vld [vmem:[%s304_s1 + $0x78] sm:$0xff]  ;;  %vm24_vm2 = vcmp.ge.s32.totalorder %v13_v32, 64  ;;  %v134_v38 = vadd.s32 4294967200, %v13_v32 }
   0x7   :  { %224 = vset.pattern.permute.xlu1 %v230_v13  ;;  %19 = vperm.xlu0 %222, %v11_v1   ;;  %v211_v30 = vpack.c.bf16 %v56_v29, %v55_v28  ;;  %v23_v37 = vsel %vm17_vm1, %v132_v33, %v13_v32  ;;  %vm31_vm3 = vcmp.ge.s32.totalorder %v13_v32, 96 }
   0x8   :  { %33 = vperm.xlu1 %224, %v11_v1   ;;  %v30_v39 = vsel %vm24_vm2, %v133_v34, %v23_v37 }
   0x9   :  { %194 = vmatpush3.bf16.msra.mxu0 %v193_v9  ;;  %v37_v43 = vsel %vm31_vm3, %v134_v38, %v30_v39 }
   0xa   :  { %195 = vmatprep.subr.bf16.mxu0 %v228_v8 }
   0xb   :  { %225 = vset.pattern.permute.xlu0 %v230_v13 }
   0xd   :  { %197 = vmatpush3.bf16.msra.mxu0 %v196_v14 }
   0xe   :  { %198 = vmatprep.subr.bf16.mxu0 %v228_v8 }
  0x11   :  { %200 = vmatpush3.bf16.msra.mxu0 %v199_v18 }
  0x12   :  { %201 = vmatprep.subr.bf16.mxu0 %v228_v8 }
  0x15   :  { %203 = vmatpush3.bf16.msra.mxu0 %v202_v21 }
  0x16   :  { %204 = vmatprep.subr.bf16.mxu0 %v228_v8 }
  0x19   :  { %206 = vmatpush3.bf16.msra.mxu0 %v205_v24 }
  0x1a   :  { %207 = vmatprep.subr.bf16.mxu0 %v228_v8 }
  0x1d   :  { %209 = vmatpush3.bf16.msra.mxu0 %v208_v27 }
  0x1e   :  { %210 = vmatprep.subr.bf16.mxu0 %v228_v8 }
  0x21   :  { %212 = vmatpush3.bf16.msra.mxu0 %v211_v30 }
  0x81   :  { %v16_v35 = vpop.permute.xlu0 %15  ;;  %v27_v36 = vpop.permute.xlu1 %26 }
  0x86   :  { %v20_v40 = vpop.permute.xlu0 %19 }
  0x87   :  { %v34_v41 = vpop.permute.xlu1 %33  ;;  %v21_v42 = vsel %vm17_vm1, %v20_v40, %v16_v35 }
  0x88   :  { %v28_v44 = vsel %vm24_vm2, %v27_v36, %v21_v42 }
  0x89   :  { %v35_v45 = vsel %vm31_vm3, %v34_v41, %v28_v44 }
  0x8a   :  { %vm38_vm4 = vcmp.eq.s32.totalorder %v35_v45, %v37_v43 }
  0x8b   :  { %187 = vmatmul.mubr.msk.f32.vlgmr.msra.gmra.mrb[0].mxu0 %vm38_vm4, %v233_v46 }
 0x15e   :  { %v123_v47 = vpop.f32.mrb[0].mxu0 }
 0x15f   :  { %127 = vst [vmem:[%s305_s2] sm:$0xff] %v123_v47  ;;  %v188_v48 = vpop.f32.mrb[1].mxu0 }

</bundles_post_ra>
